<compile_context>
chip_gen: v5e
topology: v5e:2x2
jax: 0.10.0
libtpu: 0.0.40
codegen_flags: <defaults>
</compile_context>

<pallas_src>
import math

import jax
import jax.numpy as jnp
from jax import lax
from jax.experimental import pallas as pl
from jax.experimental.pallas import tpu as pltpu


def _make_encoder_kernel(num_heads: int, d_k: int, seq_len: int, q_tile: int,
                         eps: float = 1e-12):
    H, dk, T, TQ = num_heads, d_k, seq_len, q_tile

    def kernel(x_ref,
               wq_ref, bq_ref, wk_ref, bk_ref, wv_ref, bv_ref, wo_ref, bo_ref,
               w1_ref, b1_ref, w2_ref, b2_ref,
               g1_ref, be1_ref, g2_ref, be2_ref,
               o_ref,
               x1_scr, k_scr, v_scr):
        qi = pl.program_id(1)

        def layernorm(v, g, b):
            mu = jnp.mean(v, axis=-1, keepdims=True)
            var = jnp.mean((v - mu) ** 2, axis=-1, keepdims=True)
            return (v - mu) * lax.rsqrt(var + eps) * g + b

        # ---- per-batch prologue: ln1 of the full sequence + K/V projections,
        #      cached in VMEM scratch and reused by every query tile ----------
        @pl.when(qi == 0)
        def _():
            xf = x_ref[0].astype(jnp.float32)                      # (T, D)
            x1 = layernorm(xf, g1_ref[0], be1_ref[0])              # (T, D) f32
            x1_scr[...] = x1
            x1b = x1.astype(jnp.bfloat16)
            k = jnp.dot(x1b, wk_ref[...],
                        preferred_element_type=jnp.float32) + bk_ref[0]
            v = jnp.dot(x1b, wv_ref[...],
                        preferred_element_type=jnp.float32) + bv_ref[0]
            k_scr[...] = k.astype(jnp.bfloat16)
            v_scr[...] = v.astype(jnp.bfloat16)

        # ---- query tile ------------------------------------------------------
        row0 = pl.multiple_of(qi * TQ, TQ)
        x1q = x1_scr[pl.ds(row0, TQ), :]                           # (TQ, D) f32

        # wq / bq already carry the 1/sqrt(d_k) scale (folded in the wrapper).
        q = jnp.dot(x1q.astype(jnp.bfloat16), wq_ref[...],
                    preferred_element_type=jnp.float32) + bq_ref[0]

        q3 = q.astype(jnp.bfloat16).reshape(TQ, H, dk)             # (TQ, H, dk)
        k3 = k_scr[...].reshape(T, H, dk)                          # (T,  H, dk)
        v3 = v_scr[...].reshape(T, H, dk)                          # (T,  H, dk)

        # Batched multi-head attention (heads batched into one einsum per stage).
        s = jnp.einsum('qhd,khd->hqk', q3, k3,
                       preferred_element_type=jnp.float32)         # (H, TQ, T)
        s = s - jnp.max(s, axis=-1, keepdims=True)
        e = jnp.exp(s)                                             # EUP
        denom = jnp.sum(e, axis=-1, keepdims=True)
        r = pl.reciprocal(denom, approx=True)                      # EUP
        r = r * (2.0 - denom * r)       # one Newton step -> ~f32 accuracy
        p = (e * r).astype(jnp.bfloat16)

        a = jnp.einsum('hqk,khd->hqd', p, v3,
                       preferred_element_type=jnp.float32)         # (H, TQ, dk)
        attn = jnp.transpose(a, (1, 0, 2)).reshape(TQ, H * dk)     # (TQ, D)

        h = jnp.dot(attn.astype(jnp.bfloat16), wo_ref[...],
                    preferred_element_type=jnp.float32) + bo_ref[0]

        # residual 1 — the module adds to ln1(x) (x was rebound), keep that quirk
        x2 = x1q + h
        x3 = layernorm(x2, g2_ref[0], be2_ref[0])

        # ---- FFN -------------------------------------------------------------
        f = jnp.dot(x3.astype(jnp.bfloat16), w1_ref[...],
                    preferred_element_type=jnp.float32) + b1_ref[0]
        f = jnp.maximum(f, 0.0)
        f = jnp.dot(f.astype(jnp.bfloat16), w2_ref[...],
                    preferred_element_type=jnp.float32) + b2_ref[0]

        # residual 2
        o_ref[0] = (x3 + f).astype(o_ref.dtype)

    return kernel


def _const_block_spec(shape):
    """Constant-index block; single-buffered (the block never changes)."""
    n = len(shape)

    def index_map(b, q):
        return (0,) * n

    try:
        return pl.BlockSpec(shape, index_map, pipeline_mode=pl.Buffered(1))
    except Exception:  # older jax without pipeline_mode / Buffered
        return pl.BlockSpec(shape, index_map)


def transformer_encoder(x, params, num_heads, q_tile=None):
    """x: (B, T, D) float32. params: dict of f32 weights. Returns (B, T, D)."""
    B, T, D = x.shape
    d_ff = params["w1"].shape[1]
    assert D % num_heads == 0
    d_k = D // num_heads
    scale = 1.0 / math.sqrt(d_k)

    # Query tile: whole sequence when short, else 256 (fills the 256-wide MXU on
    # v6e/v7x) or 128.  Non-full tiles must be sublane(8)-aligned; production
    # d_model / d_ff should be multiples of 128 for lane-dense stores.
    if q_tile is None:
        if T <= 256:
            q_tile = T
        elif T % 256 == 0:
            q_tile = 256
        else:
            q_tile = 128
    assert T % q_tile == 0
    if q_tile != T:
        assert q_tile % 8 == 0
    n_q = T // q_tile

    kernel = _make_encoder_kernel(num_heads, d_k, T, q_tile)

    f32, bf16 = jnp.float32, jnp.bfloat16
    # bf16 weights for the MXU (f32 accumulation); 1/sqrt(d_k) folded into Q.
    wq = (params["wq"].astype(f32) * scale).astype(bf16)
    bq = params["bq"].astype(f32) * scale
    wk = params["wk"].astype(bf16)
    wv = params["wv"].astype(bf16)
    wo = params["wo"].astype(bf16)
    w1 = params["w1"].astype(bf16)
    w2 = params["w2"].astype(bf16)
    bk, bv, bo = params["bk"], params["bv"], params["bo"]
    b1, b2 = params["b1"], params["b2"]
    g1, be1, g2, be2 = params["g1"], params["be1"], params["g2"], params["be2"]

    # ---- generation-aware VMEM budget ----
    w_bytes = 2 * (4 * D * D + 2 * D * d_ff)                 # bf16, single-buffered
    b_bytes = 4 * (5 * D + d_ff + 4 * D)                     # f32 biases + LN params
    io_bytes = 4 * 2 * (T * D + q_tile * D)                  # x in + out tile (2x buffered)
    scr_bytes = 4 * T * D + 2 * 2 * T * D                    # x1 f32 + K/V bf16 scratch
    live_bytes = 4 * (2 * num_heads * q_tile * T + q_tile * d_ff
                      + 8 * q_tile * D + 2 * T * D)
    est_bytes = w_bytes + b_bytes + io_bytes + scr_bytes + live_bytes
    try:
        vmem_cap = int(getattr(pltpu.get_tpu_info(), "vmem_capacity_bytes",
                               64 * 1024 * 1024))
    except Exception:
        vmem_cap = 64 * 1024 * 1024
    vmem_limit = int(min(max(est_bytes + (4 << 20), 32 << 20),
                         int(0.85 * vmem_cap)))

    # Advisory cost estimate so XLA can schedule neighbours around this call.
    flops = B * (2 * T * D * D * 4          # q/k/v/o projections
                 + 2 * T * T * D * 2        # scores + apply
                 + 2 * T * D * d_ff * 2)    # FFN
    cost = pl.CostEstimate(
        flops=int(flops),
        transcendentals=int(B * num_heads * T * T),
        bytes_accessed=int(2 * B * T * D * 4 + w_bytes + b_bytes),
    )

    in_specs = [
        pl.BlockSpec((1, T, D), lambda b, q: (b, 0, 0)),      # x, full seq / batch
        _const_block_spec((D, D)), _const_block_spec((1, D)),         # wq, bq
        _const_block_spec((D, D)), _const_block_spec((1, D)),         # wk, bk
        _const_block_spec((D, D)), _const_block_spec((1, D)),         # wv, bv
        _const_block_spec((D, D)), _const_block_spec((1, D)),         # wo, bo
        _const_block_spec((D, d_ff)), _const_block_spec((1, d_ff)),   # w1, b1
        _const_block_spec((d_ff, D)), _const_block_spec((1, D)),      # w2, b2
        _const_block_spec((1, D)), _const_block_spec((1, D)),         # ln1 g, b
        _const_block_spec((1, D)), _const_block_spec((1, D)),         # ln2 g, b
    ]

    return pl.pallas_call(
        kernel,
        out_shape=jax.ShapeDtypeStruct((B, T, D), x.dtype),
        grid_spec=pltpu.PrefetchScalarGridSpec(
            num_scalar_prefetch=0,
            grid=(B, n_q),                    # batch parallel, q tiles sequential
            in_specs=in_specs,
            out_specs=pl.BlockSpec((1, q_tile, D), lambda b, q: (b, q, 0)),
            scratch_shapes=[
                pltpu.VMEM((T, D), jnp.float32),     # ln1(x), full sequence
                pltpu.VMEM((T, D), jnp.bfloat16),    # K (pre-head-split)
                pltpu.VMEM((T, D), jnp.bfloat16),    # V
            ],
        ),
        compiler_params=pltpu.CompilerParams(
            dimension_semantics=("parallel", "arbitrary"),
            vmem_limit_bytes=vmem_limit,
        ),
        cost_estimate=cost,
    )(x, wq, bq, wk, bk, wv, bv, wo, bo, w1, b1, w2, b2, g1, be1, g2, be2)


def reference_encoder(x, params, num_heads):
    """Pure-JAX reference mirroring the PyTorch forward (dropout = identity),
    with the same bf16 quantization at MXU inputs the kernel uses."""
    B, T, D = x.shape
    d_k = D // num_heads
    scale = 1.0 / math.sqrt(d_k)
    bf = lambda a: a.astype(jnp.bfloat16)

    def ln(v, g, b):
        mu = jnp.mean(v, axis=-1, keepdims=True)
        var = jnp.mean((v - mu) ** 2, axis=-1, keepdims=True)
        return (v - mu) * lax.rsqrt(var + 1e-12) * g[0] + b[0]

    def proj(a, w, b):
        return jnp.einsum("btd,df->btf", bf(a), bf(w),
                          preferred_element_type=jnp.float32) + b[0]

    x1 = ln(x, params["g1"], params["be1"])
    q = proj(x1, params["wq"] * scale, params["bq"] * scale)
    k = proj(x1, params["wk"], params["bk"])
    v = proj(x1, params["wv"], params["bv"])
    q = q.reshape(B, T, num_heads, d_k).transpose(0, 2, 1, 3)
    k = k.reshape(B, T, num_heads, d_k).transpose(0, 2, 1, 3)
    v = v.reshape(B, T, num_heads, d_k).transpose(0, 2, 1, 3)
    s = jnp.einsum("bhqd,bhkd->bhqk", bf(q), bf(k),
                   preferred_element_type=jnp.float32)
    w = jax.nn.softmax(s, axis=-1)
    a = jnp.einsum("bhqk,bhkd->bhqd", bf(w), bf(v),
                   preferred_element_type=jnp.float32)
    a = a.transpose(0, 2, 1, 3).reshape(B, T, D)
    h = proj(a, params["wo"], params["bo"])
    x2 = x1 + h
    x3 = ln(x2, params["g2"], params["be2"])
    f = jnp.maximum(proj(x3, params["w1"], params["b1"]), 0.0)
    f = proj(f, params["w2"], params["b2"])
    return x3 + f


def init_params(key, d_model, d_ff):
    ks = jax.random.split(key, 6)

    def xavier(k, fan_in, fan_out):
        lim = math.sqrt(6.0 / (fan_in + fan_out))
        return jax.random.uniform(k, (fan_in, fan_out), jnp.float32, -lim, lim)

    return {
        "wq": xavier(ks[0], d_model, d_model), "bq": jnp.zeros((1, d_model), jnp.float32),
        "wk": xavier(ks[1], d_model, d_model), "bk": jnp.zeros((1, d_model), jnp.float32),
        "wv": xavier(ks[2], d_model, d_model), "bv": jnp.zeros((1, d_model), jnp.float32),
        "wo": xavier(ks[3], d_model, d_model), "bo": jnp.zeros((1, d_model), jnp.float32),
        "w1": xavier(ks[4], d_model, d_ff),    "b1": jnp.zeros((1, d_ff), jnp.float32),
        "w2": xavier(ks[5], d_ff, d_model),    "b2": jnp.zeros((1, d_model), jnp.float32),
        "g1": jnp.ones((1, d_model), jnp.float32), "be1": jnp.zeros((1, d_model), jnp.float32),
        "g2": jnp.ones((1, d_model), jnp.float32), "be2": jnp.zeros((1, d_model), jnp.float32),
    }


if __name__ == "__main__":
    B, T, D = 2, 8, 32
    NUM_HEADS = 4
    D_FF = 4 * D

    key = jax.random.PRNGKey(0)
    kx, kp = jax.random.split(key)
    x = jax.random.normal(kx, (B, T, D), jnp.float32)
    params = init_params(kp, D, D_FF)

    out = transformer_encoder(x, params, NUM_HEADS)
    out = jax.block_until_ready(out)

    ref = reference_encoder(x, params, NUM_HEADS)
    assert out.shape == (B, T, D)
    # Tolerance covers bf16 rounding-boundary jitter between the two paths;
    # real structural bugs at these magnitudes are O(0.1-1), far above it.
    assert jnp.allclose(out, ref, rtol=1e-2, atol=1e-2), "mismatch vs reference"

    print("KERNEL_OK")
</pallas_src>

<mosaic_0001>
module attributes {stable_mosaic.version = 11 : i64} {
  func.func @kernel(%arg0: i32, %arg1: i32, %arg2: memref<1x8x32xf32, #tpu.memory_space<vmem>>, %arg3: memref<32x32xbf16, #tpu.memory_space<vmem>>, %arg4: memref<1x32xf32, #tpu.memory_space<vmem>>, %arg5: memref<32x32xbf16, #tpu.memory_space<vmem>>, %arg6: memref<1x32xf32, #tpu.memory_space<vmem>>, %arg7: memref<32x32xbf16, #tpu.memory_space<vmem>>, %arg8: memref<1x32xf32, #tpu.memory_space<vmem>>, %arg9: memref<32x32xbf16, #tpu.memory_space<vmem>>, %arg10: memref<1x32xf32, #tpu.memory_space<vmem>>, %arg11: memref<32x128xbf16, #tpu.memory_space<vmem>>, %arg12: memref<1x128xf32, #tpu.memory_space<vmem>>, %arg13: memref<128x32xbf16, #tpu.memory_space<vmem>>, %arg14: memref<1x32xf32, #tpu.memory_space<vmem>>, %arg15: memref<1x32xf32, #tpu.memory_space<vmem>>, %arg16: memref<1x32xf32, #tpu.memory_space<vmem>>, %arg17: memref<1x32xf32, #tpu.memory_space<vmem>>, %arg18: memref<1x32xf32, #tpu.memory_space<vmem>>, %arg19: memref<1x8x32xf32, #tpu.memory_space<vmem>>, %arg20: memref<8x32xf32, #tpu.memory_space<vmem>>, %arg21: memref<8x32xbf16, #tpu.memory_space<vmem>>, %arg22: memref<8x32xbf16, #tpu.memory_space<vmem>>) attributes {dimension_semantics = [#tpu.dimension_semantics<parallel>, #tpu.dimension_semantics<arbitrary>], iteration_bounds = array<i64: 2, 1>, scalar_prefetch = 0 : i64, scratch_operands = 3 : i64, tpu.core_type = #tpu.core_type<tc>, window_params = [{transform_indices = @transform_0, window_bounds = array<i64: 1, 8, 32>}, {pipeline_mode = #tpu.pipeline_mode<synchronous>, transform_indices = @transform_1, window_bounds = array<i64: 32, 32>}, {pipeline_mode = #tpu.pipeline_mode<synchronous>, transform_indices = @transform_2, window_bounds = array<i64: 1, 32>}, {pipeline_mode = #tpu.pipeline_mode<synchronous>, transform_indices = @transform_3, window_bounds = array<i64: 32, 32>}, {pipeline_mode = #tpu.pipeline_mode<synchronous>, transform_indices = @transform_4, window_bounds = array<i64: 1, 32>}, {pipeline_mode = #tpu.pipeline_mode<synchronous>, transform_indices = @transform_5, window_bounds = array<i64: 32, 32>}, {pipeline_mode = #tpu.pipeline_mode<synchronous>, transform_indices = @transform_6, window_bounds = array<i64: 1, 32>}, {pipeline_mode = #tpu.pipeline_mode<synchronous>, transform_indices = @transform_7, window_bounds = array<i64: 32, 32>}, {pipeline_mode = #tpu.pipeline_mode<synchronous>, transform_indices = @transform_8, window_bounds = array<i64: 1, 32>}, {pipeline_mode = #tpu.pipeline_mode<synchronous>, transform_indices = @transform_9, window_bounds = array<i64: 32, 128>}, {pipeline_mode = #tpu.pipeline_mode<synchronous>, transform_indices = @transform_10, window_bounds = array<i64: 1, 128>}, {pipeline_mode = #tpu.pipeline_mode<synchronous>, transform_indices = @transform_11, window_bounds = array<i64: 128, 32>}, {pipeline_mode = #tpu.pipeline_mode<synchronous>, transform_indices = @transform_12, window_bounds = array<i64: 1, 32>}, {pipeline_mode = #tpu.pipeline_mode<synchronous>, transform_indices = @transform_13, window_bounds = array<i64: 1, 32>}, {pipeline_mode = #tpu.pipeline_mode<synchronous>, transform_indices = @transform_14, window_bounds = array<i64: 1, 32>}, {pipeline_mode = #tpu.pipeline_mode<synchronous>, transform_indices = @transform_15, window_bounds = array<i64: 1, 32>}, {pipeline_mode = #tpu.pipeline_mode<synchronous>, transform_indices = @transform_16, window_bounds = array<i64: 1, 32>}, {transform_indices = @transform_17, window_bounds = array<i64: 1, 8, 32>}]} {
    %c0_i32 = arith.constant 0 : i32
    %0 = arith.cmpi eq, %arg1, %c0_i32 : i32
    %1 = arith.extui %0 : i1 to i32
    %c0_i32_0 = arith.constant 0 : i32
    %2 = arith.cmpi ne, %1, %c0_i32_0 : i32
    scf.if %2 {
      %c0_42 = arith.constant 0 : index
      %c0_43 = arith.constant 0 : index
      %c0_44 = arith.constant 0 : index
      %99 = vector.load %arg2[%c0_42, %c0_43, %c0_44] : memref<1x8x32xf32, #tpu.memory_space<vmem>>, vector<1x8x32xf32>
      %100 = vector.shape_cast %99 : vector<1x8x32xf32> to vector<8x32xf32>
      %c0_45 = arith.constant 0 : index
      %c0_46 = arith.constant 0 : index
      %101 = vector.load %arg15[%c0_45, %c0_46] : memref<1x32xf32, #tpu.memory_space<vmem>>, vector<1x32xf32>
      %102 = vector.shape_cast %101 : vector<1x32xf32> to vector<32xf32>
      %c0_47 = arith.constant 0 : index
      %c0_48 = arith.constant 0 : index
      %103 = vector.load %arg16[%c0_47, %c0_48] : memref<1x32xf32, #tpu.memory_space<vmem>>, vector<1x32xf32>
      %104 = vector.shape_cast %103 : vector<1x32xf32> to vector<32xf32>
      %cst_49 = arith.constant dense<0.000000e+00> : vector<8xf32>
      %105 = vector.multi_reduction <add>, %100, %cst_49 [1] : vector<8x32xf32> to vector<8xf32>
      %106 = vector.shape_cast %105 : vector<8xf32> to vector<8x1xf32>
      %cst_50 = arith.constant 3.200000e+01 : f32
      %107 = vector.broadcast %cst_50 : f32 to vector<8x1xf32>
      %108 = arith.divf %106, %107 : vector<8x1xf32>
      %109 = vector.broadcast %108 : vector<8x1xf32> to vector<8x32xf32>
      %110 = arith.subf %100, %109 : vector<8x32xf32>
      %111 = arith.mulf %110, %110 : vector<8x32xf32>
      %cst_51 = arith.constant dense<0.000000e+00> : vector<8xf32>
      %112 = vector.multi_reduction <add>, %111, %cst_51 [1] : vector<8x32xf32> to vector<8xf32>
      %113 = vector.shape_cast %112 : vector<8xf32> to vector<8x1xf32>
      %cst_52 = arith.constant 3.200000e+01 : f32
      %114 = vector.broadcast %cst_52 : f32 to vector<8x1xf32>
      %115 = arith.divf %113, %114 : vector<8x1xf32>
      %116 = vector.broadcast %108 : vector<8x1xf32> to vector<8x32xf32>
      %117 = arith.subf %100, %116 : vector<8x32xf32>
      %cst_53 = arith.constant 9.99999996E-13 : f32
      %118 = vector.broadcast %cst_53 : f32 to vector<8x1xf32>
      %119 = arith.addf %115, %118 : vector<8x1xf32>
      %120 = math.rsqrt %119 : vector<8x1xf32>
      %121 = vector.broadcast %120 : vector<8x1xf32> to vector<8x32xf32>
      %122 = arith.mulf %117, %121 : vector<8x32xf32>
      %123 = vector.shape_cast %102 : vector<32xf32> to vector<1x32xf32>
      %124 = vector.broadcast %123 : vector<1x32xf32> to vector<8x32xf32>
      %125 = arith.mulf %122, %124 : vector<8x32xf32>
      %126 = vector.shape_cast %104 : vector<32xf32> to vector<1x32xf32>
      %127 = vector.broadcast %126 : vector<1x32xf32> to vector<8x32xf32>
      %128 = arith.addf %125, %127 : vector<8x32xf32>
      %c0_54 = arith.constant 0 : index
      %c0_55 = arith.constant 0 : index
      %129 = vector.load %arg20[%c0_54, %c0_55] : memref<8x32xf32, #tpu.memory_space<vmem>>, vector<8x32xf32>
      tpu.vector_store %arg20[%c0_54, %c0_55], %128 {strides = array<i32>} : memref<8x32xf32, #tpu.memory_space<vmem>>, vector<8x32xf32>,
      %130 = arith.truncf %128 : vector<8x32xf32> to vector<8x32xbf16>
      %c0_56 = arith.constant 0 : index
      %c0_57 = arith.constant 0 : index
      %131 = vector.load %arg5[%c0_56, %c0_57] : memref<32x32xbf16, #tpu.memory_space<vmem>>, vector<32x32xbf16>
      %cst_58 = arith.constant dense<0.000000e+00> : vector<8x32xf32>
      %132 = tpu.matmul %130, %131, %cst_58 {dimension_numbers = #tpu.dot_dimension_numbers<[1], [0], [0], [1], [0, 0, 1, 1], [], []>} : vector<8x32xbf16>, vector<32x32xbf16>, vector<8x32xf32> -> vector<8x32xf32>
      %c0_59 = arith.constant 0 : index
      %c0_60 = arith.constant 0 : index
      %133 = vector.load %arg6[%c0_59, %c0_60] : memref<1x32xf32, #tpu.memory_space<vmem>>, vector<1x32xf32>
      %134 = vector.shape_cast %133 : vector<1x32xf32> to vector<32xf32>
      %135 = vector.shape_cast %134 : vector<32xf32> to vector<1x32xf32>
      %136 = vector.broadcast %135 : vector<1x32xf32> to vector<8x32xf32>
      %137 = arith.addf %132, %136 : vector<8x32xf32>
      %c0_61 = arith.constant 0 : index
      %c0_62 = arith.constant 0 : index
      %138 = vector.load %arg7[%c0_61, %c0_62] : memref<32x32xbf16, #tpu.memory_space<vmem>>, vector<32x32xbf16>
      %cst_63 = arith.constant dense<0.000000e+00> : vector<8x32xf32>
      %139 = tpu.matmul %130, %138, %cst_63 {dimension_numbers = #tpu.dot_dimension_numbers<[1], [0], [0], [1], [0, 0, 1, 1], [], []>} : vector<8x32xbf16>, vector<32x32xbf16>, vector<8x32xf32> -> vector<8x32xf32>
      %c0_64 = arith.constant 0 : index
      %c0_65 = arith.constant 0 : index
      %140 = vector.load %arg8[%c0_64, %c0_65] : memref<1x32xf32, #tpu.memory_space<vmem>>, vector<1x32xf32>
      %141 = vector.shape_cast %140 : vector<1x32xf32> to vector<32xf32>
      %142 = vector.shape_cast %141 : vector<32xf32> to vector<1x32xf32>
      %143 = vector.broadcast %142 : vector<1x32xf32> to vector<8x32xf32>
      %144 = arith.addf %139, %143 : vector<8x32xf32>
      %145 = arith.truncf %137 : vector<8x32xf32> to vector<8x32xbf16>
      %c0_66 = arith.constant 0 : index
      %c0_67 = arith.constant 0 : index
      %146 = vector.load %arg21[%c0_66, %c0_67] : memref<8x32xbf16, #tpu.memory_space<vmem>>, vector<8x32xbf16>
      tpu.vector_store %arg21[%c0_66, %c0_67], %145 {strides = array<i32>} : memref<8x32xbf16, #tpu.memory_space<vmem>>, vector<8x32xbf16>,
      %147 = arith.truncf %144 : vector<8x32xf32> to vector<8x32xbf16>
      %c0_68 = arith.constant 0 : index
      %c0_69 = arith.constant 0 : index
      %148 = vector.load %arg22[%c0_68, %c0_69] : memref<8x32xbf16, #tpu.memory_space<vmem>>, vector<8x32xbf16>
      tpu.vector_store %arg22[%c0_68, %c0_69], %147 {strides = array<i32>} : memref<8x32xbf16, #tpu.memory_space<vmem>>, vector<8x32xbf16>,
    } else {
    }
    %c8_i32 = arith.constant 8 : i32
    %3 = arith.muli %arg1, %c8_i32 : i32
    %4 = tpu.assume_multiple %3, 8 : i32
    %5 = arith.index_cast %4 : i32 to index
    %c0 = arith.constant 0 : index
    %6 = vector.load %arg20[%5, %c0] : memref<8x32xf32, #tpu.memory_space<vmem>>, vector<8x32xf32>
    %7 = arith.truncf %6 : vector<8x32xf32> to vector<8x32xbf16>
    %c0_1 = arith.constant 0 : index
    %c0_2 = arith.constant 0 : index
    %8 = vector.load %arg3[%c0_1, %c0_2] : memref<32x32xbf16, #tpu.memory_space<vmem>>, vector<32x32xbf16>
    %cst = arith.constant dense<0.000000e+00> : vector<8x32xf32>
    %9 = tpu.matmul %7, %8, %cst {dimension_numbers = #tpu.dot_dimension_numbers<[1], [0], [0], [1], [0, 0, 1, 1], [], []>} : vector<8x32xbf16>, vector<32x32xbf16>, vector<8x32xf32> -> vector<8x32xf32>
    %c0_3 = arith.constant 0 : index
    %c0_4 = arith.constant 0 : index
    %10 = vector.load %arg4[%c0_3, %c0_4] : memref<1x32xf32, #tpu.memory_space<vmem>>, vector<1x32xf32>
    %11 = vector.shape_cast %10 : vector<1x32xf32> to vector<32xf32>
    %12 = vector.shape_cast %11 : vector<32xf32> to vector<1x32xf32>
    %13 = vector.broadcast %12 : vector<1x32xf32> to vector<8x32xf32>
    %14 = arith.addf %9, %13 : vector<8x32xf32>
    %15 = arith.truncf %14 : vector<8x32xf32> to vector<8x32xbf16>
    %16 = vector.shape_cast %15 : vector<8x32xbf16> to vector<8x4x8xbf16>
    %c0_5 = arith.constant 0 : index
    %c0_6 = arith.constant 0 : index
    %17 = vector.load %arg21[%c0_5, %c0_6] : memref<8x32xbf16, #tpu.memory_space<vmem>>, vector<8x32xbf16>
    %18 = vector.shape_cast %17 : vector<8x32xbf16> to vector<8x4x8xbf16>
    %c0_7 = arith.constant 0 : index
    %c0_8 = arith.constant 0 : index
    %19 = vector.load %arg22[%c0_7, %c0_8] : memref<8x32xbf16, #tpu.memory_space<vmem>>, vector<8x32xbf16>
    %20 = vector.shape_cast %19 : vector<8x32xbf16> to vector<8x4x8xbf16>
    "tpu.trace_start"() <{level = 10 : i32, message = "qhd,khd->hqk"}> : () -> ()
    %cst_9 = arith.constant dense<0.000000e+00> : vector<4x8x8xf32>
    %21 = tpu.matmul %16, %18, %cst_9 {dimension_numbers = #tpu.dot_dimension_numbers<[2], [2], [0], [0], [0, 1, 0, 0, 1, 0], [1], [1]>} : vector<8x4x8xbf16>, vector<8x4x8xbf16>, vector<4x8x8xf32> -> vector<4x8x8xf32>
    "tpu.trace_stop"() : () -> ()
    %cst_10 = arith.constant dense<0xFF800000> : vector<4x8xf32>
    %22 = vector.multi_reduction <maximumf>, %21, %cst_10 [2] : vector<4x8x8xf32> to vector<4x8xf32>
    %23 = vector.shape_cast %22 : vector<4x8xf32> to vector<4x8x1xf32>
    %24 = vector.broadcast %23 : vector<4x8x1xf32> to vector<4x8x8xf32>
    %25 = arith.subf %21, %24 : vector<4x8x8xf32>
    %26 = math.exp %25 : vector<4x8x8xf32>
    %cst_11 = arith.constant dense<0.000000e+00> : vector<4x8xf32>
    %27 = vector.multi_reduction <add>, %26, %cst_11 [2] : vector<4x8x8xf32> to vector<4x8xf32>
    %28 = vector.shape_cast %27 : vector<4x8xf32> to vector<4x8x1xf32>
    %29 = tpu.reciprocal %28 {approx = true} : vector<4x8x1xf32> -> vector<4x8x1xf32>
    %30 = arith.mulf %28, %29 : vector<4x8x1xf32>
    %cst_12 = arith.constant 2.000000e+00 : f32
    %31 = vector.broadcast %cst_12 : f32 to vector<4x8x1xf32>
    %32 = arith.subf %31, %30 : vector<4x8x1xf32>
    %33 = arith.mulf %29, %32 : vector<4x8x1xf32>
    %34 = vector.broadcast %33 : vector<4x8x1xf32> to vector<4x8x8xf32>
    %35 = arith.mulf %26, %34 : vector<4x8x8xf32>
    %36 = arith.truncf %35 : vector<4x8x8xf32> to vector<4x8x8xbf16>
    "tpu.trace_start"() <{level = 10 : i32, message = "hqk,khd->hqd"}> : () -> ()
    %cst_13 = arith.constant dense<0.000000e+00> : vector<4x8x8xf32>
    %37 = tpu.matmul %36, %20, %cst_13 {dimension_numbers = #tpu.dot_dimension_numbers<[2], [0], [1], [2], [0, 0, 0, 1, 1, 2], [0], [1]>} : vector<4x8x8xbf16>, vector<8x4x8xbf16>, vector<4x8x8xf32> -> vector<4x8x8xf32>
    "tpu.trace_stop"() : () -> ()
    %38 = tpu.transpose %37, [1, 0, 2] : vector<4x8x8xf32> -> vector<8x4x8xf32>
    %39 = vector.shape_cast %38 : vector<8x4x8xf32> to vector<8x32xf32>
    %40 = arith.truncf %39 : vector<8x32xf32> to vector<8x32xbf16>
    %c0_14 = arith.constant 0 : index
    %c0_15 = arith.constant 0 : index
    %41 = vector.load %arg9[%c0_14, %c0_15] : memref<32x32xbf16, #tpu.memory_space<vmem>>, vector<32x32xbf16>
    %cst_16 = arith.constant dense<0.000000e+00> : vector<8x32xf32>
    %42 = tpu.matmul %40, %41, %cst_16 {dimension_numbers = #tpu.dot_dimension_numbers<[1], [0], [0], [1], [0, 0, 1, 1], [], []>} : vector<8x32xbf16>, vector<32x32xbf16>, vector<8x32xf32> -> vector<8x32xf32>
    %c0_17 = arith.constant 0 : index
    %c0_18 = arith.constant 0 : index
    %43 = vector.load %arg10[%c0_17, %c0_18] : memref<1x32xf32, #tpu.memory_space<vmem>>, vector<1x32xf32>
    %44 = vector.shape_cast %43 : vector<1x32xf32> to vector<32xf32>
    %45 = vector.shape_cast %44 : vector<32xf32> to vector<1x32xf32>
    %46 = vector.broadcast %45 : vector<1x32xf32> to vector<8x32xf32>
    %47 = arith.addf %42, %46 : vector<8x32xf32>
    %48 = arith.addf %6, %47 : vector<8x32xf32>
    %c0_19 = arith.constant 0 : index
    %c0_20 = arith.constant 0 : index
    %49 = vector.load %arg17[%c0_19, %c0_20] : memref<1x32xf32, #tpu.memory_space<vmem>>, vector<1x32xf32>
    %50 = vector.shape_cast %49 : vector<1x32xf32> to vector<32xf32>
    %c0_21 = arith.constant 0 : index
    %c0_22 = arith.constant 0 : index
    %51 = vector.load %arg18[%c0_21, %c0_22] : memref<1x32xf32, #tpu.memory_space<vmem>>, vector<1x32xf32>
    %52 = vector.shape_cast %51 : vector<1x32xf32> to vector<32xf32>
    %cst_23 = arith.constant dense<0.000000e+00> : vector<8xf32>
    %53 = vector.multi_reduction <add>, %48, %cst_23 [1] : vector<8x32xf32> to vector<8xf32>
    %54 = vector.shape_cast %53 : vector<8xf32> to vector<8x1xf32>
    %cst_24 = arith.constant 3.200000e+01 : f32
    %55 = vector.broadcast %cst_24 : f32 to vector<8x1xf32>
    %56 = arith.divf %54, %55 : vector<8x1xf32>
    %57 = vector.broadcast %56 : vector<8x1xf32> to vector<8x32xf32>
    %58 = arith.subf %48, %57 : vector<8x32xf32>
    %59 = arith.mulf %58, %58 : vector<8x32xf32>
    %cst_25 = arith.constant dense<0.000000e+00> : vector<8xf32>
    %60 = vector.multi_reduction <add>, %59, %cst_25 [1] : vector<8x32xf32> to vector<8xf32>
    %61 = vector.shape_cast %60 : vector<8xf32> to vector<8x1xf32>
    %cst_26 = arith.constant 3.200000e+01 : f32
    %62 = vector.broadcast %cst_26 : f32 to vector<8x1xf32>
    %63 = arith.divf %61, %62 : vector<8x1xf32>
    %64 = vector.broadcast %56 : vector<8x1xf32> to vector<8x32xf32>
    %65 = arith.subf %48, %64 : vector<8x32xf32>
    %cst_27 = arith.constant 9.99999996E-13 : f32
    %66 = vector.broadcast %cst_27 : f32 to vector<8x1xf32>
    %67 = arith.addf %63, %66 : vector<8x1xf32>
    %68 = math.rsqrt %67 : vector<8x1xf32>
    %69 = vector.broadcast %68 : vector<8x1xf32> to vector<8x32xf32>
    %70 = arith.mulf %65, %69 : vector<8x32xf32>
    %71 = vector.shape_cast %50 : vector<32xf32> to vector<1x32xf32>
    %72 = vector.broadcast %71 : vector<1x32xf32> to vector<8x32xf32>
    %73 = arith.mulf %70, %72 : vector<8x32xf32>
    %74 = vector.shape_cast %52 : vector<32xf32> to vector<1x32xf32>
    %75 = vector.broadcast %74 : vector<1x32xf32> to vector<8x32xf32>
    %76 = arith.addf %73, %75 : vector<8x32xf32>
    %77 = arith.truncf %76 : vector<8x32xf32> to vector<8x32xbf16>
    %c0_28 = arith.constant 0 : index
    %c0_29 = arith.constant 0 : index
    %78 = vector.load %arg11[%c0_28, %c0_29] : memref<32x128xbf16, #tpu.memory_space<vmem>>, vector<32x128xbf16>
    %cst_30 = arith.constant dense<0.000000e+00> : vector<8x128xf32>
    %79 = tpu.matmul %77, %78, %cst_30 {dimension_numbers = #tpu.dot_dimension_numbers<[1], [0], [0], [1], [0, 0, 1, 1], [], []>} : vector<8x32xbf16>, vector<32x128xbf16>, vector<8x128xf32> -> vector<8x128xf32>
    %c0_31 = arith.constant 0 : index
    %c0_32 = arith.constant 0 : index
    %80 = vector.load %arg12[%c0_31, %c0_32] : memref<1x128xf32, #tpu.memory_space<vmem>>, vector<1x128xf32>
    %81 = vector.shape_cast %80 : vector<1x128xf32> to vector<128xf32>
    %82 = vector.shape_cast %81 : vector<128xf32> to vector<1x128xf32>
    %83 = vector.broadcast %82 : vector<1x128xf32> to vector<8x128xf32>
    %84 = arith.addf %79, %83 : vector<8x128xf32>
    %cst_33 = arith.constant 0.000000e+00 : f32
    %85 = vector.broadcast %cst_33 : f32 to vector<8x128xf32>
    %86 = arith.maximumf %84, %85 : vector<8x128xf32>
    %87 = arith.truncf %86 : vector<8x128xf32> to vector<8x128xbf16>
    %c0_34 = arith.constant 0 : index
    %c0_35 = arith.constant 0 : index
    %88 = vector.load %arg13[%c0_34, %c0_35] : memref<128x32xbf16, #tpu.memory_space<vmem>>, vector<128x32xbf16>
    %cst_36 = arith.constant dense<0.000000e+00> : vector<8x32xf32>
    %89 = tpu.matmul %87, %88, %cst_36 {dimension_numbers = #tpu.dot_dimension_numbers<[1], [0], [0], [1], [0, 0, 1, 1], [], []>} : vector<8x128xbf16>, vector<128x32xbf16>, vector<8x32xf32> -> vector<8x32xf32>
    %c0_37 = arith.constant 0 : index
    %c0_38 = arith.constant 0 : index
    %90 = vector.load %arg14[%c0_37, %c0_38] : memref<1x32xf32, #tpu.memory_space<vmem>>, vector<1x32xf32>
    %91 = vector.shape_cast %90 : vector<1x32xf32> to vector<32xf32>
    %92 = vector.shape_cast %91 : vector<32xf32> to vector<1x32xf32>
    %93 = vector.broadcast %92 : vector<1x32xf32> to vector<8x32xf32>
    %94 = arith.addf %89, %93 : vector<8x32xf32>
    %95 = arith.addf %76, %94 : vector<8x32xf32>
    %c0_39 = arith.constant 0 : index
    %c0_40 = arith.constant 0 : index
    %c0_41 = arith.constant 0 : index
    %96 = vector.load %arg19[%c0_39, %c0_40, %c0_41] : memref<1x8x32xf32, #tpu.memory_space<vmem>>, vector<1x8x32xf32>
    %97 = vector.shape_cast %96 : vector<1x8x32xf32> to vector<8x32xf32>
    %98 = vector.shape_cast %95 : vector<8x32xf32> to vector<1x8x32xf32>
    tpu.vector_store %arg19[%c0_39, %c0_40, %c0_41], %98 {strides = array<i32>} : memref<1x8x32xf32, #tpu.memory_space<vmem>>, vector<1x8x32xf32>,
    return
  }
  func.func @transform_0(%arg0: i32, %arg1: i32) -> (i32, i32, i32) {
    %c0_i32 = arith.constant 0 : i32
    %c0_i32_0 = arith.constant 0 : i32
    %c0_i32_1 = arith.constant 0 : i32
    return %arg0, %c0_i32, %c0_i32_0 : i32, i32, i32
  }
  func.func @transform_1(%arg0: i32, %arg1: i32) -> (i32, i32) {
    %c0_i32 = arith.constant 0 : i32
    %c0_i32_0 = arith.constant 0 : i32
    %c0_i32_1 = arith.constant 0 : i32
    return %c0_i32, %c0_i32_0 : i32, i32
  }
  func.func @transform_2(%arg0: i32, %arg1: i32) -> (i32, i32) {
    %c0_i32 = arith.constant 0 : i32
    %c0_i32_0 = arith.constant 0 : i32
    %c0_i32_1 = arith.constant 0 : i32
    return %c0_i32, %c0_i32_0 : i32, i32
  }
  func.func @transform_3(%arg0: i32, %arg1: i32) -> (i32, i32) {
    %c0_i32 = arith.constant 0 : i32
    %c0_i32_0 = arith.constant 0 : i32
    %c0_i32_1 = arith.constant 0 : i32
    return %c0_i32, %c0_i32_0 : i32, i32
  }
  func.func @transform_4(%arg0: i32, %arg1: i32) -> (i32, i32) {
    %c0_i32 = arith.constant 0 : i32
    %c0_i32_0 = arith.constant 0 : i32
    %c0_i32_1 = arith.constant 0 : i32
    return %c0_i32, %c0_i32_0 : i32, i32
  }
  func.func @transform_5(%arg0: i32, %arg1: i32) -> (i32, i32) {
    %c0_i32 = arith.constant 0 : i32
    %c0_i32_0 = arith.constant 0 : i32
    %c0_i32_1 = arith.constant 0 : i32
    return %c0_i32, %c0_i32_0 : i32, i32
  }
  func.func @transform_6(%arg0: i32, %arg1: i32) -> (i32, i32) {
    %c0_i32 = arith.constant 0 : i32
    %c0_i32_0 = arith.constant 0 : i32
    %c0_i32_1 = arith.constant 0 : i32
    return %c0_i32, %c0_i32_0 : i32, i32
  }
  func.func @transform_7(%arg0: i32, %arg1: i32) -> (i32, i32) {
    %c0_i32 = arith.constant 0 : i32
    %c0_i32_0 = arith.constant 0 : i32
    %c0_i32_1 = arith.constant 0 : i32
    return %c0_i32, %c0_i32_0 : i32, i32
  }
  func.func @transform_8(%arg0: i32, %arg1: i32) -> (i32, i32) {
    %c0_i32 = arith.constant 0 : i32
    %c0_i32_0 = arith.constant 0 : i32
    %c0_i32_1 = arith.constant 0 : i32
    return %c0_i32, %c0_i32_0 : i32, i32
  }
  func.func @transform_9(%arg0: i32, %arg1: i32) -> (i32, i32) {
    %c0_i32 = arith.constant 0 : i32
    %c0_i32_0 = arith.constant 0 : i32
    %c0_i32_1 = arith.constant 0 : i32
    return %c0_i32, %c0_i32_0 : i32, i32
  }
  func.func @transform_10(%arg0: i32, %arg1: i32) -> (i32, i32) {
    %c0_i32 = arith.constant 0 : i32
    %c0_i32_0 = arith.constant 0 : i32
    %c0_i32_1 = arith.constant 0 : i32
    return %c0_i32, %c0_i32_0 : i32, i32
  }
  func.func @transform_11(%arg0: i32, %arg1: i32) -> (i32, i32) {
    %c0_i32 = arith.constant 0 : i32
    %c0_i32_0 = arith.constant 0 : i32
    %c0_i32_1 = arith.constant 0 : i32
    return %c0_i32, %c0_i32_0 : i32, i32
  }
  func.func @transform_12(%arg0: i32, %arg1: i32) -> (i32, i32) {
    %c0_i32 = arith.constant 0 : i32
    %c0_i32_0 = arith.constant 0 : i32
    %c0_i32_1 = arith.constant 0 : i32
    return %c0_i32, %c0_i32_0 : i32, i32
  }
  func.func @transform_13(%arg0: i32, %arg1: i32) -> (i32, i32) {
    %c0_i32 = arith.constant 0 : i32
    %c0_i32_0 = arith.constant 0 : i32
    %c0_i32_1 = arith.constant 0 : i32
    return %c0_i32, %c0_i32_0 : i32, i32
  }
  func.func @transform_14(%arg0: i32, %arg1: i32) -> (i32, i32) {
    %c0_i32 = arith.constant 0 : i32
    %c0_i32_0 = arith.constant 0 : i32
    %c0_i32_1 = arith.constant 0 : i32
    return %c0_i32, %c0_i32_0 : i32, i32
  }
  func.func @transform_15(%arg0: i32, %arg1: i32) -> (i32, i32) {
    %c0_i32 = arith.constant 0 : i32
    %c0_i32_0 = arith.constant 0 : i32
    %c0_i32_1 = arith.constant 0 : i32
    return %c0_i32, %c0_i32_0 : i32, i32
  }
  func.func @transform_16(%arg0: i32, %arg1: i32) -> (i32, i32) {
    %c0_i32 = arith.constant 0 : i32
    %c0_i32_0 = arith.constant 0 : i32
    %c0_i32_1 = arith.constant 0 : i32
    return %c0_i32, %c0_i32_0 : i32, i32
  }
  func.func @transform_17(%arg0: i32, %arg1: i32) -> (i32, i32, i32) {
    %c0_i32 = arith.constant 0 : i32
    %c0_i32_0 = arith.constant 0 : i32
    return %arg0, %arg1, %c0_i32 : i32, i32, i32
  }
}

</mosaic_0001>

<bundles_post_ra>
// kernel: tpu_custom_call.1
= control target key start
LH: loop header
LB: loop body
LE: loop exit
PB: predicated region body
PF: predicated region fallthrough
CT: control target
= control target key end

     0   :  { %s2180_s0 = inlined_call_operand.vmem [shape: f32[2,8,32], index: 0, kind: input, shape index: {}]   ;;  %s2181_s1 = inlined_call_operand.vmem [shape: bf16[32,32], index: 1, kind: input, shape index: {}]   ;;  %s2182_s2 = inlined_call_operand.vmem [shape: f32[1,32], index: 2, kind: input, shape index: {}]   ;;  %s2183_s3 = inlined_call_operand.vmem [shape: bf16[32,32], index: 3, kind: input, shape index: {}]   ;;  %s2184_s4 = inlined_call_operand.vmem [shape: f32[1,32], index: 4, kind: input, shape index: {}]   ;;  %s2185_s5 = inlined_call_operand.vmem [shape: bf16[32,32], index: 5, kind: input, shape index: {}]   ;;  %s2186_s6 = inlined_call_operand.vmem [shape: f32[1,32], index: 6, kind: input, shape index: {}]   ;;  %s2187_s7 = inlined_call_operand.vmem [shape: bf16[32,32], index: 7, kind: input, shape index: {}]   ;;  %s2188_s8 = inlined_call_operand.vmem [shape: f32[1,32], index: 8, kind: input, shape index: {}]   ;;  %s2189_s9 = inlined_call_operand.hbm [shape: bf16[32,128], index: 9, kind: input, shape index: {}]   ;;  %s2190_s10 = inlined_call_operand.vmem [shape: f32[1,128], index: 10, kind: input, shape index: {}]   ;;  %s2191_s11 = inlined_call_operand.vmem [shape: bf16[128,32], index: 11, kind: input, shape index: {}]   ;;  %s2192_s12 = inlined_call_operand.vmem [shape: f32[1,32], index: 12, kind: input, shape index: {}]   ;;  %s2193_s13 = inlined_call_operand.vmem [shape: f32[1,32], index: 13, kind: input, shape index: {}]   ;;  %s2194_s14 = inlined_call_operand.vmem [shape: f32[1,32], index: 14, kind: input, shape index: {}]   ;;  %s2195_s15 = inlined_call_operand.vmem [shape: f32[1,32], index: 15, kind: input, shape index: {}]   ;;  %s2196_s16 = inlined_call_operand.vmem [shape: f32[1,32], index: 16, kind: input, shape index: {}]   ;;  %s2197_s17 = inlined_call_operand.hbm [shape: f32[2,8,32], index: 17, kind: output, shape index: {}]  }
   0x1   :  { %2205 = sst [smem:[#allocation15_spill]] %s2180_s0 }
   0x2   :  { %2206 = sst [smem:[#allocation16_spill]] %s2181_s1 }
   0x3   :  { %2207 = sst [smem:[#allocation17_spill]] %s2182_s2 }
   0x4   :  { %2208 = sst [smem:[#allocation18_spill]] %s2183_s3 }
   0x5   :  { %2209 = sst [smem:[#allocation19_spill]] %s2184_s4 }
   0x6   :  { %2210 = sst [smem:[#allocation20_spill]] %s2185_s5 }
   0x7   :  { %2211 = sst [smem:[#allocation21_spill]] %s2189_s9 }
   0x8   :  { %2212 = sst [smem:[#allocation22_spill]] %s2197_s17 }
   0x9   :  { %22 = vsyncpa [#allocation6], 0 }
   0xa   :  { %23 = vsyncpa [#allocation7], 0 }
   0xb   :  { %25 = vsyncpa [#allocation7 + $0x1], 0  ;;  %s1914_s24 = smov 0   ;;  %s1916_s25 = smov 0  }
   0xc   :  { %s1918_s26 = smov 0   ;;  %s1920_s27 = smov 0  }
   0xd   :  { %s1922_s28 = smov 0   ;;  %s1924_s29 = smov 0  }
   0xe LB: > { %2213 = sst [smem:[#allocation11_spill]] %s1790_s24  ;;  %s1469_s0 = sadd.s32 4294967295, %s1810_s29   ;;  %s1810_s29 = sphi %s1924_s29, %s31_s29   ;;  %s1806_s28 = sphi %s1922_s28, %s2230_s28   ;;  %s1802_s27 = sphi %s1920_s27, %s2229_s27   ;;  %s1798_s26 = sphi %s1918_s26, %s2233_s26   ;;  %s1794_s25 = sphi %s1916_s25, %s2232_s25   ;;  %s1790_s24 = sphi %s1914_s24, %s2231_s24  }
   0xf   : > { %2214 = sst [smem:[#allocation12_spill]] %s1806_s28  ;;  %s1470_s30 = sadd.s32 4294967294, %s1810_s29  }
  0x10   : > { %s43_s18 = sadd.s32 1, %s1806_s28  ;;  %s414_s19 = sadd.s32 1, %s1798_s26 }
  0x11   : > { %p45_p0 = scmp.ge.s32.totalorder %s43_s18, 2  ;;  %p424_p1 = scmp.ne.s32.totalorder %s1798_s26, %s1794_s25 }
  0x12   : > { %p425_p2 = scmp.eq.s32.totalorder %s1469_s0, 1  ;;  %p430_p3 = scmp.ne.s32.totalorder %s1794_s25, %s1790_s24 }
  0x13   : > { %s2235_s18 = smov (%p45_p0, %s43_s18), 0  ;;  %p431_p5 = scmp.eq.s32.totalorder %s1470_s30, 1 }
  0x14   : > { %2215 = sst [smem:[#allocation13_spill]] %s2235_s18  ;;  %p1954_p4 = por %p425_p2, %p424_p1 }
  0x15   : > { %s409_s20 = ssub.s32 %s1806_s28, %s2235_s18  ;;  %p1471_p6 = scmp.ge.s32.totalorder %s1810_s29, 1 }
  0x16   : > { %s2216_s1 = scalar_select %p1954_p4, 1, 0 }
  0x17   : > { %p412_p7 = scmp.eq.s32.totalorder %s409_s20, 0  ;;  %p1961_p8 = por %p431_p5, %p430_p3 }
  0x18   : > { %2217 = sst [smem:[#allocation14_spill]] %s2216_s1  ;;  %p438_p9 = scmp.lt.s32.totalorder %s1810_s29, 3 }
  0x19   : > { %s1967_s22 = scalar_select %p412_p7, %s1798_s26, %s414_s19  }
  0x1a   : > { %p439_p10 = pnand %p1471_p6, %p438_p9  ;;  %p1599_p11 = scmp.eq.s32.totalorder %s1469_s0, 0 }
  0x1b   : > { %s2219_s9 = sld [smem:[#allocation21_spill]]  ;;  %s1812_s1 = smov [#allocation5]  }
  0x1c   : > { %p1591_p12 = pneg %p439_p10  ;;  %s475_s30 = sshll.u32 %s1812_s1, 4  ;;  %s476_s30 = int_to_ptr.vmem [resolvable:$true] %s475_s30 }
  0x1d   : > { %s1813_s20 = smov 64   ;;  %s1814_s18 = smov 4  }
  0x1e   : > { %p1592_p13 = pnand %p1599_p11, %p1591_p12  ;;  %519 = sbr.rel (%p439_p10) target bundleno = 2105 (0x839), region = 88 }
  0x21   : > { %s473_s17 = sshll.u32 %s2219_s9, 4  ;;  %s474_s17 = int_to_ptr.hbm [resolvable:$true] %s473_s17 }
  0x22   : > { %1594 = dma.hbm_to_vmem [thread:$0]  (!%p1592_p13), %s474_s17, 256, %s476_s30, [#allocation6], %s1813_s20, %s1813_s20, %s1814_s18  }
  0x23   : > { %1781 = dma.done.wait (%p1599_p11), [#allocation6], 256  }
  0x24   : > { %1783 = vsyncadd (%p1599_p11), [#allocation6], 4294967040  ;;  %p571_p0 = scmp.lt.s32.totalorder %s1802_s27, 1  ;;  %s2220_s23 = sld [smem:[#allocation15_spill]]  ;;  %vm583_vm0 = vcmask 261120   ;;  %v1815_v2 = vmov 32.0  }
  0x25   : > { %1676 = vrcp.f32 %v1815_v2  ;;  %s2221_s3 = sld [smem:[#allocation18_spill]]  ;;  %v1666_v29 = vld [vmem:[%s2193_s13] ss:$0 sm:$0xff]  ;;  %vm693_vm5 = vcmask 257024   ;;  %s1817_s17 = smov 120   ;;  %vm833_vm6 = vcmask 1043456  }
  0x26   : > { %s572_s0 = scalar_select %p571_p0, %s1802_s27, 1  ;;  %v1667_v32 = vld [vmem:[%s2194_s14] ss:$0 sm:$0xff]  ;;  %vm829_vm7 = vcmask 64512   ;;  %vm1044_vm8 = vcmask 1047556   ;;  %vm1167_vm9 = vcmask 130048  }
  0x27   : > { %s2222_s20 = sld [smem:[#allocation16_spill]]  ;;  %v1670_v45 = vld [vmem:[%s2186_s6] ss:$0 sm:$0xff]  ;;  %s1818_s1 = smov 112   ;;  %vm1169_vm10 = vcmask 195584  }
  0x28   : > { %s1477_s19 = sshll.u32 %s572_s0, 3  ;;  %s2223_s5 = sld [smem:[#allocation20_spill]] }
  0x29   : > { %s2224_s4 = sld [smem:[#allocation19_spill]]  ;;  %s1821_s30 = smov 16  }
  0x2a   : > { %s574_s9 = scalar_lea.vmem %s2220_s23, %s1477_s19  ;;  %s2225_s2 = sld [smem:[#allocation17_spill]] }
  0x2b   : > { %v580_v0 = vld [vmem:[%s574_s9] sm:$0xff]  ;;  %v1677_v3 = vpop.eup %1676  ;;  %v1568_v14 = vld [vmem:[%s2221_s3 + $0x8] sm:$0xff]  ;;  %s1816_s9 = smov 104   ;;  %s1822_s0 = smov 24  }
  0x2c   : > { %v584_v1 = vsel %vm583_vm0, %v580_v0, 0.0  ;;  %v588_v4 = vmul.f32 32.0, %v1677_v3  ;;  %vm592_vm1 = vweird.f32 %v1677_v3  ;;  %652 = vmatpush.bf16.msra.mxu1 %v1568_v14  ;;  %v1567_v15 = vld [vmem:[%s2221_s3] sm:$0xff]  ;;  %s1823_s19 = smov 8   ;;  %s1564_s24 = sshll.u32 %s1802_s27, 3 }
  0x2d   : > { %585 = vadd.xlane.f32.xlu0 %v584_v1  ;;  %v1572_v16 = vld [vmem:[%s2222_s20 + $0x8] sm:$0xff]  ;;  %v1571_v18 = vld [vmem:[%s2222_s20] sm:$0xff]  ;;  %s2226_s18 = sld [smem:[#allocation22_spill]] }
  0x2e   : > { %v589_v5 = vsub.f32 1.0, %v588_v4  ;;  %731 = vmatpush.bf16.msra.mxu2 %v1572_v16  ;;  %v1570_v21 = vld [vmem:[%s2223_s5 + $0x8] sm:$0xff]  ;;  %v1569_v22 = vld [vmem:[%s2223_s5] sm:$0xff] }
  0x2f   : > { %v1668_v38 = vld [vmem:[%s2224_s4] ss:$0 sm:$0xff] }
  0x30   : > { %v590_v6 = vmul.f32 %v1677_v3, %v589_v5  ;;  %653 = vmatpush.bf16.msra.mxu1 %v1567_v15  ;;  %v1669_v43 = vld [vmem:[%s2225_s2] ss:$0 sm:$0xff] }
  0x32   : > { %v591_v7 = vadd.f32 %v1677_v3, %v590_v6  ;;  %732 = vmatpush.bf16.msra.mxu2 %v1571_v18 }
  0x33   : > { %s1382_s3 = scalar_lea.hbm %s2226_s18, %s1564_s24 }
  0x34   : > { %v1978_v8 = vsel %vm592_vm1, %v1677_v3, %v591_v7  ;;  %685 = vmatpush.bf16.msrb.mxu1 %v1570_v21  ;;  %s1386_s4 = sshll.u32 %s1382_s3, 4  ;;  %s1387_s4 = int_to_ptr.hbm [resolvable:$true] %s1386_s4 }
  0x35   : > { %s1742_s5 = sshra.s32 %s1387_s4, 4  ;;  %s1743_s5 = int_to_ptr.hbm [resolvable:$true] %s1742_s5 }
  0x36   : > { %s1744_s23 = scalar_lea.hbm %s1743_s5, 8  ;;  %p1749_p5 = scmp.lt.s32.totalorder %s1743_s5, %s2226_s18 }
  0x37   : > { %p1745_p1 = scmp.ne.s32.totalorder %s1743_s5, %s1744_s23 }
  0x38   : > { %686 = vmatpush.bf16.msrb.mxu1 %v1569_v22 }
  0x39   : > { %p1746_p2 = pnand %p1745_p1, %p1954_p4 }
  0x3b   : > { %p1747_p3 = pneg %p1746_p2 }
  0xa0   : > { %v586_v9 = vpop.xlane.xlu0 %585 }
  0xa1   : > { %v594_v10 = vmul.f32 %v1978_v8, %v586_v9 }
  0xa3   : > { %v595_v11 = vsub.f32 %v580_v0, %v594_v10 }
  0xa5   : > { %v596_v12 = vmul.f32 %v595_v11, %v595_v11 }
  0xa7   : > { %v597_v13 = vsel %vm583_vm0, %v596_v12, 0.0 }
  0xa8   : > { %598 = vadd.xlane.f32.xlu0 %v597_v13 }
 0x11b   : > { %v599_v17 = vpop.xlane.xlu0 %598 }
 0x11c   : > { %v600_v19 = vmul.f32 %v599_v17, %v1978_v8 }
 0x11e   : > { %v601_v20 = vadd.f32 1e-12, %v600_v19 }
 0x120   : > { %1678 = vrsqrt.f32 %v601_v20  ;;  %vm608_vm3 = vweird.f32 %v601_v20 }
 0x126   : > { %v1679_v23 = vpop.eup %1678 }
 0x127   : > { %v603_v24 = vmul.f32 %v1679_v23, %v601_v20  ;;  %vm609_vm2 = vweird.f32 %v1679_v23 }
 0x128   : > { %vm610_vm4 = vmor %vm608_vm3, %vm609_vm2 }
 0x129   : > { %v604_v25 = vmul.f32 %v1679_v23, %v603_v24 }
 0x12b   : > { %v605_v26 = vmul.f32 0.5, %v604_v25 }
 0x12d   : > { %v606_v27 = vsub.f32 1.5, %v605_v26 }
 0x12f   : > { %v607_v28 = vmul.f32 %v1679_v23, %v606_v27 }
 0x131   : > { %v611_v30 = vsel %vm610_vm4, %v1679_v23, %v607_v28 }
 0x132   : > { %v612_v31 = vmul.f32 %v611_v30, %v595_v11 }
 0x134   : > { %v616_v33 = vmul.f32 %v1666_v29, %v612_v31 }
 0x136   : > { %v620_v34 = vadd.f32 %v1667_v32, %v616_v33 }
 0x138   : > { %621 = vst.msk [vmem:[#allocation2] sm:$0xff] %vm583_vm0, %v620_v34  ;;  %v622_v35 = vpack.c.bf16 %v620_v34, %v620_v34 }
 0x13a   : > { %1486 = vmatmul.msk.bf16.vlgmr.msra.gmra.mxu1 %vm583_vm0, %v622_v35 }
 0x13f   : > { %v2009_v36 = vld [vmem:[#allocation2] sm:$0xff] }
 0x140   : > { %v700_v37 = vpack.c.bf16 %v2009_v36, %v2009_v36 }
 0x142   : > { %1504 = vmatmul.msk.bf16.vlgmr.msra.gmra.mxu2 %vm583_vm0, %v700_v37 }
 0x14a   : > { %1495 = vmatmul.msk.bf16.vlgmr.msrb.gmra.mxu1 %vm583_vm0, %v622_v35 }
 0x1b7   : > { %v655_v39 = vpop.f32.mrf.mxu1 }
 0x1b8   : > { %v656_v40 = vadd.f32 %v1668_v38, %v655_v39 }
 0x1ba   : > { %v692_v41 = vpack.c.bf16 %v656_v40, %v656_v40 }
 0x1bc   : > { %694 = vst.msk [vmem:[#allocation3] sm:$0xf] %vm693_vm5, %v692_v41 }
 0x1bf   : > { %v657_v42 = vpop.f32.mrf.mxu1 }
 0x1c3   : > { %v746_v44 = vld [vmem:[#allocation3] sm:$0xf] }
 0x1c4   : > { %754 = vrot.lane.b32.xlu2 %v746_v44, %s1816_s9  ;;  %748 = vrot.lane.b32.xlu1 %v746_v44, %s1817_s17 }
 0x1c5   : > { %v734_v46 = vpop.f32.mrf.mxu2 }
 0x1c6   : > { %v735_v47 = vadd.f32 %v1669_v43, %v734_v46 }
 0x1c7   : > { %v688_v48 = vpop.f32.mrf.mxu1 }
 0x1c8   : > { %v738_v49 = vpack.c.bf16 %v735_v47, %v735_v47  ;;  %v689_v50 = vadd.f32 %v1670_v45, %v688_v48 }
 0x1ca   : > { %v695_v51 = vpack.c.bf16 %v689_v50, %v689_v50  ;;  %740 = vrot.lane.b32.xlu0 %v738_v49, %s1817_s17 }
 0x1cc   : > { %696 = vst.msk [vmem:[#allocation4] sm:$0xf] %vm693_vm5, %v695_v51  ;;  %751 = vrot.lane.b32.xlu1 %v746_v44, %s1818_s1 }
 0x1cd   : > { %v736_v52 = vpop.f32.mrf.mxu2 }
 0x1cf   : > { %v690_v53 = vpop.f32.mrf.mxu1 }
 0x1d3   : > { %v2030_v54 = vld [vmem:[#allocation4] sm:$0xf] }
 0x1d4   : > { %742 = vrot.lane.b32.xlu1 %v738_v49, %s1818_s1  ;;  %v971_v55 = vsel %vm833_vm6, %v2030_v54, 0 }
 0x1d5   : > { %980 = vmatpush.bf16.msrb.mxu2 %v971_v55 }
 0x1dc   : > { %744 = vrot.lane.b32.xlu1 %v738_v49, %s1816_s9 }
 0x1ea   : > { %765 = vxpose.xlu2.c.b16.start.end [1/1] (short) (narrow) %v746_v44, 16 }
 0x21e   : > { %v755_v56 = vpop.permute.xlu2 %754 }
 0x21f   : > { %813 = vxpose.xlu0.c.b16.start.end [1/1] (short) (narrow) %v755_v56, 16 }
 0x236   : > { %v749_v57 = vpop.permute.xlu1 %748 }
 0x23c   : > { %v741_v61 = vpop.permute.xlu0 %740 }
 0x23e   : > { %v752_v58 = vpop.permute.xlu1 %751 }
 0x23f   : > { %1663 = vxpose.binary.xlu1.c.b16.start.end [1/2] (short) (narrow) %v752_v58, %v749_v57, 16 }
 0x246   : > { %v743_v62 = vpop.permute.xlu1 %742 }
 0x24e   : > { %v745_v1 = vpop.permute.xlu1 %744 }
 0x28b   : > { %v773_v59 = vpop.trf.xlu2 }
 0x28c   : > { %v835_v60 = vsel %vm833_vm6, %v773_v59, 0 }
 0x28d   : > { %844 = vmatpush.bf16.msra.mxu3 %v835_v60 }
 0x290   : > { %1505 = vmatmul.msk.bf16.vlgmr.msra.gmra.mxu3 %vm829_vm7, %v738_v49 }
 0x2cb   : > { %v821_v63 = vpop.trf.xlu0 }
 0x2cc   : > { %v892_v0 = vsel %vm833_vm6, %v821_v63, 0 }
 0x2cd   : > { %901 = vmatpush.bf16.msra.mxu1 %v892_v0 }
 0x2d0   : > { %1508 = vmatmul.msk.bf16.vlgmr.msra.gmra.mxu1 %vm829_vm7, %v745_v1 }
 0x2eb   : > { %v1664_v2 = vpop.trf.xlu1 }
 0x2ec   : > { %v854_v3 = vsel %vm833_vm6, %v1664_v2, 0 }
 0x2ed   : > { %863 = vmatpush.bf16.msrb.mxu3 %v854_v3 }
 0x2f0   : > { %1506 = vmatmul.msk.bf16.vlgmr.msrb.gmra.mxu3 %vm829_vm7, %v741_v61 }
 0x2f3   : > { %v1665_v4 = vpop.trf.xlu1 }
 0x2f4   : > { %v873_v5 = vsel %vm833_vm6, %v1665_v4, 0 }
 0x2f5   : > { %882 = vmatpush.bf16.msra.mxu0 %v873_v5 }
 0x2f8   : > { %1507 = vmatmul.msk.bf16.vlgmr.msra.gmra.mxu0 %vm829_vm7, %v743_v62 }
 0x313   : > { %v846_v6 = vpop.f32.mrf.mxu3 }
 0x314   : > { %v907_v7 = vsel %vm829_vm7, %v846_v6, -inf }
 0x315   : > { %908 = vmax.xlane.f32.xlu2 %v907_v7 }
 0x31b   : > { %v848_v9 = vpop.f32.mrf.mxu3 }
 0x34d   : > { %v903_v10 = vpop.f32.mrf.mxu1 }
 0x34e   : > { %v916_v11 = vsel %vm829_vm7, %v903_v10, -inf }
 0x34f   : > { %917 = vmax.xlane.f32.xlu2 %v916_v11 }
 0x355   : > { %v905_v12 = vpop.f32.mrf.mxu1 }
 0x373   : > { %v865_v13 = vpop.f32.mrf.mxu3 }
 0x374   : > { %v910_v14 = vsel %vm829_vm7, %v865_v13, -inf }
 0x375   : > { %v884_v15 = vpop.f32.mrf.mxu0  ;;  %911 = vmax.xlane.f32.xlu0 %v910_v14 }
 0x376   : > { %v913_v16 = vsel %vm829_vm7, %v884_v15, -inf }
 0x377   : > { %914 = vmax.xlane.f32.xlu1 %v913_v16 }
 0x37b   : > { %v867_v17 = vpop.f32.mrf.mxu3 }
 0x37d   : > { %v886_v18 = vpop.f32.mrf.mxu0 }
 0x388   : > { %v909_v19 = vpop.xlane.xlu2 %908 }
 0x389   : > { %v919_v20 = vsub.f32 %v846_v6, %v909_v19 }
 0x38b   : > { %v923_v21 = vmul.f32 1.442695, %v919_v20 }
 0x38d   : > { %1680 = vpow2.f32 %v923_v21 }
 0x393   : > { %v1681_v22 = vpop.eup %1680 }
 0x394   : > { %v931_v23 = vsel %vm829_vm7, %v1681_v22, 0.0 }
 0x395   : > { %932 = vadd.xlane.f32.xlu2 %v931_v23  ;;  %v1820_v23 = vmov 1934713408  }
 0x3c2   : > { %v918_v24 = vpop.xlane.xlu2 %917 }
 0x3c3   : > { %v922_v25 = vsub.f32 %v903_v10, %v918_v24  ;;  %v1073_v24 = vunpack.c.l.s4 %v1820_v23 }
 0x3c5   : > { %v929_v26 = vmul.f32 1.442695, %v922_v25 }
 0x3c7   : > { %1682 = vpow2.f32 %v929_v26 }
 0x3cd   : > { %v1683_v27 = vpop.eup %1682 }
 0x3ce   : > { %v940_v28 = vsel %vm829_vm7, %v1683_v27, 0.0 }
 0x3cf   : > { %941 = vadd.xlane.f32.xlu0 %v940_v28 }
 0x3e3   : > { %763 = vrot.lane.b32.xlu0 %v2030_v54, %s1816_s9 }
 0x3e8   : > { %v912_v29 = vpop.xlane.xlu0 %911 }
 0x3e9   : > { %v920_v30 = vsub.f32 %v865_v13, %v912_v29 }
 0x3ea   : > { %v915_v31 = vpop.xlane.xlu1 %914 }
 0x3eb   : > { %v925_v32 = vmul.f32 1.442695, %v920_v30  ;;  %v921_v33 = vsub.f32 %v884_v15, %v915_v31  ;;  %v1819_v15 = vmov 1983009808   ;;  %v1074_v31 = vunpack.c.0.s8 %v1073_v24 }
 0x3ec   : > { %v1049_v16 = vunpack.c.l.s4 %v1819_v15 }
 0x3ed   : > { %1684 = vpow2.f32 %v925_v32  ;;  %v927_v34 = vmul.f32 1.442695, %v921_v33 }
 0x3ee   : > { %v1050_v20 = vunpack.c.0.s8 %v1049_v16 }
 0x3ef   : > { %1686 = vpow2.f32 %v927_v34 }
 0x3f3   : > { %v1685_v35 = vpop.eup %1684 }
 0x3f4   : > { %v934_v37 = vsel %vm829_vm7, %v1685_v35, 0.0 }
 0x3f5   : > { %v1687_v38 = vpop.eup %1686  ;;  %935 = vadd.xlane.f32.xlu2 %v934_v37 }
 0x3f6   : > { %v937_v39 = vsel %vm829_vm7, %v1687_v38, 0.0 }
 0x3f7   : > { %938 = vadd.xlane.f32.xlu1 %v937_v39 }
 0x408   : > { %v933_v40 = vpop.xlane.xlu2 %932 }
 0x409   : > { %1688 = vrcp.f32 %v933_v40 }
 0x40d   : > { %759 = vrot.lane.b32.xlu2 %v2030_v54, %s1817_s17 }
 0x40f   : > { %v1689_v41 = vpop.eup %1688 }
 0x410   : > { %v947_v42 = vmul.f32 %v1689_v41, %v933_v40  ;;  %761 = vrot.lane.b32.xlu1 %v2030_v54, %s1818_s1 }
 0x412   : > { %v951_v43 = vsub.f32 2.0, %v947_v42 }
 0x414   : > { %v955_v44 = vmul.f32 %v1689_v41, %v951_v43 }
 0x416   : > { %v959_v45 = vmul.f32 %v1681_v22, %v955_v44 }
 0x418   : > { %v963_v46 = vpack.c.bf16 %v959_v45, %v959_v45 }
 0x41a   : > { %1509 = vmatmul.msk.bf16.vlgmr.msrb.gmra.mxu2 %vm829_vm7, %v963_v46 }
 0x442   : > { %v942_v47 = vpop.xlane.xlu0 %941 }
 0x443   : > { %1690 = vrcp.f32 %v942_v47 }
 0x449   : > { %v1691_v48 = vpop.eup %1690 }
 0x44a   : > { %v950_v49 = vmul.f32 %v1691_v48, %v942_v47 }
 0x44c   : > { %v954_v50 = vsub.f32 2.0, %v950_v49 }
 0x44e   : > { %v958_v51 = vmul.f32 %v1691_v48, %v954_v50 }
 0x450   : > { %v962_v52 = vmul.f32 %v1683_v27, %v958_v51 }
 0x452   : > { %v966_v56 = vpack.c.bf16 %v962_v52, %v962_v52 }
 0x455   : > { %v764_v53 = vpop.permute.xlu0 %763 }
 0x456   : > { %v1028_v55 = vsel %vm833_vm6, %v764_v53, 0 }
 0x457   : > { %1037 = vmatpush.bf16.msrb.mxu1 %v1028_v55 }
 0x45a   : > { %1512 = vmatmul.msk.bf16.vlgmr.msrb.gmra.mxu1 %vm829_vm7, %v966_v56 }
 0x468   : > { %v936_v54 = vpop.xlane.xlu2 %935 }
 0x469   : > { %1692 = vrcp.f32 %v936_v54 }
 0x46a   : > { %v939_v57 = vpop.xlane.xlu1 %938 }
 0x46b   : > { %1694 = vrcp.f32 %v939_v57 }
 0x46f   : > { %v1693_v58 = vpop.eup %1692 }
 0x470   : > { %v948_v59 = vmul.f32 %v1693_v58, %v936_v54  ;;  %v760_v60 = vpop.permute.xlu2 %759 }
 0x471   : > { %v990_v61 = vsel %vm833_vm6, %v760_v60, 0  ;;  %v1695_v62 = vpop.eup %1694 }
 0x472   : > { %v952_v63 = vsub.f32 2.0, %v948_v59  ;;  %999 = vmatpush.bf16.msra.mxu3 %v990_v61  ;;  %v949_v1 = vmul.f32 %v1695_v62, %v939_v57 }
 0x474   : > { %v956_v0 = vmul.f32 %v1693_v58, %v952_v63  ;;  %v953_v4 = vsub.f32 2.0, %v949_v1 }
 0x476   : > { %v960_v2 = vmul.f32 %v1685_v35, %v956_v0  ;;  %v957_v5 = vmul.f32 %v1695_v62, %v953_v4 }
 0x478   : > { %v964_v3 = vpack.c.bf16 %v960_v2, %v960_v2  ;;  %v961_v6 = vmul.f32 %v1687_v38, %v957_v5 }
 0x47a   : > { %1510 = vmatmul.msk.bf16.vlgmr.msra.gmra.mxu3 %vm829_vm7, %v964_v3  ;;  %v965_v10 = vpack.c.bf16 %v961_v6, %v961_v6 }
 0x482   : > { %v762_v7 = vpop.permute.xlu1 %761 }
 0x483   : > { %v1009_v9 = vsel %vm833_vm6, %v762_v7, 0 }
 0x484   : > { %1018 = vmatpush.bf16.msrb.mxu0 %v1009_v9 }
 0x487   : > { %1511 = vmatmul.msk.bf16.vlgmr.msrb.gmra.mxu0 %vm829_vm7, %v965_v10 }
 0x49d   : > { %v982_v11 = vpop.f32.mrf.mxu2 }
 0x49e   : > { %v1046_v26 = vrot.slane %v982_v11, 4 }
 0x4a5   : > { %v984_v12 = vpop.f32.mrf.mxu2 }
 0x4d7   : > { %v1039_v13 = vpop.f32.mrf.mxu1 }
 0x4d8   : > { %v1056_v19 = vrot.slane %v1039_v13, 4 }
 0x4df   : > { %v1041_v14 = vpop.f32.mrf.mxu1 }
 0x4fd   : > { %v1001_v17 = vpop.f32.mrf.mxu3 }
 0x4fe   : > { %v1058_v18 = vrot.slane %v1001_v17, 4  ;;  %v1057_v22 = vsel %vm1044_vm8, %v1056_v19, %v1001_v17 }
 0x4ff   : > { %v1063_v27 = vperm.slane %v1057_v22, %v1050_v20 }
 0x500   : > { %v1059_v21 = vsel %vm1044_vm8, %v1039_v13, %v1058_v18 }
 0x501   : > { %v1067_v25 = vperm.slane %v1059_v21, %v1050_v20  ;;  %v1068_v37 = vrot.slane %v1063_v27, 4 }
 0x503   : > { %v1080_v33 = vrot.slane %v1067_v25, 4 }
 0x504   : > { %v1020_v28 = vpop.f32.mrf.mxu0 }
 0x505   : > { %v1043_v29 = vrot.slane %v1020_v28, 4  ;;  %v1047_v30 = vsel %vm1044_vm8, %v1020_v28, %v1046_v26  ;;  %v1003_v32 = vpop.f32.mrf.mxu3  ;;  %v1573_v26 = vld [vmem:[%s2187_s7] sm:$0xff] }
 0x506   : > { %v1055_v34 = vperm.slane %v1047_v30, %v1050_v20 }
 0x507   : > { %v1045_v35 = vsel %vm1044_vm8, %v1043_v29, %v982_v11 }
 0x508   : > { %v1051_v38 = vperm.slane %v1045_v35, %v1050_v20  ;;  %v1081_v39 = vsel %vm1044_vm8, %v1080_v33, %v1055_v34  ;;  %v1082_v40 = vrot.slane %v1055_v34, 4  ;;  %v1671_v34 = vld [vmem:[%s2188_s8] ss:$0 sm:$0xff] }
 0x509   : > { %v1087_v41 = vperm.slane %v1081_v39, %v1074_v31 }
 0x50a   : > { %v1069_v42 = vsel %vm1044_vm8, %v1068_v37, %v1051_v38  ;;  %v1070_v43 = vrot.slane %v1051_v38, 4  ;;  %v1083_v44 = vsel %vm1044_vm8, %v1067_v25, %v1082_v40  ;;  %v1574_v25 = vld [vmem:[%s2187_s7 + $0x8] sm:$0xff] }
 0x50b   : > { %v1075_v45 = vperm.slane %v1069_v42, %v1074_v31  ;;  %v1091_v46 = vperm.slane %v1083_v44, %v1074_v31  ;;  %v1096_v50 = vrot.slane %v1087_v41, 4  ;;  %1201 = vmatpush.bf16.msra.mxu2 %v1574_v25 }
 0x50c   : > { %v1071_v47 = vsel %vm1044_vm8, %v1063_v27, %v1070_v43  ;;  %v1022_v48 = vpop.f32.mrf.mxu0 }
 0x50d   : > { %v1079_v49 = vperm.slane %v1071_v47, %v1074_v31  ;;  %v1098_v51 = vrot.slane %v1091_v46, 4  ;;  %v1092_v52 = vrot.slane %v1075_v45, 4  ;;  %v1097_v59 = vsel %vm1044_vm8, 0.0, %v1096_v50  ;;  %v1576_v46 = vld [vmem:[#allocation5 + $0x8] sm:$0xff]  ;;  %v1575_v47 = vld [vmem:[#allocation5] sm:$0xff] }
 0x50e   : > { %1278 = vmatpush.bf16.msrb.mxu3 %v1576_v46  ;;  %v1583_v50 = vld [vmem:[%s2191_s11 + $0x30] sm:$0xff] }
 0x50f   : > { %v1094_v53 = vrot.slane %v1079_v49, 4  ;;  %v1099_v55 = vsel %vm1044_vm8, 0.0, %v1098_v51  ;;  %v1111_v56 = vsel %vm1044_vm8, %v1098_v51, %v1087_v41  ;;  %v1093_v1 = vsel %vm1044_vm8, 0.0, %v1092_v52  ;;  %1202 = vmatpush.bf16.msra.mxu2 %v1573_v26  ;;  %v1582_v52 = vld [vmem:[%s2191_s11 + $0x28] sm:$0xff] }
 0x510   : > { %v1115_v54 = vperm.slane %v1111_v56, %v1050_v20  ;;  %v1116_v57 = vrot.slane %v1099_v55, 4 }
 0x511   : > { %v1095_v58 = vsel %vm1044_vm8, 0.0, %v1094_v53  ;;  %v1100_v60 = vsel %vm1044_vm8, %v1094_v53, %v1075_v45  ;;  %v1581_v53 = vld [vmem:[%s2191_s11 + $0x20] sm:$0xff] }
 0x512   : > { %v1117_v61 = vsel %vm1044_vm8, %v1116_v57, %v1097_v59  ;;  %v1104_v62 = vperm.slane %v1100_v60, %v1050_v20  ;;  %v1105_v63 = vrot.slane %v1095_v58, 4  ;;  %v1136_v0 = vrot.slane %v1115_v54, 4  ;;  %1279 = vmatpush.bf16.msrb.mxu3 %v1575_v47  ;;  %v1579_v58 = vld [vmem:[%s2191_s11 + $0x10] sm:$0xff] }
 0x513   : > { %v1121_v2 = vperm.slane %v1117_v61, %v1050_v20  ;;  %v1672_v61 = vld [vmem:[%s2195_s15] ss:$0 sm:$0xff] }
 0x514   : > { %v1106_v3 = vsel %vm1044_vm8, %v1105_v63, %v1093_v1  ;;  %v1124_v4 = vrot.slane %v1104_v62, 4  ;;  %v1673_v63 = vld [vmem:[%s2196_s16] ss:$0 sm:$0xff] }
 0x515   : > { %v1110_v5 = vperm.slane %v1106_v3, %v1050_v20  ;;  %v1137_v6 = vsel %vm1044_vm8, %v1121_v2, %v1136_v0  ;;  %v1134_v7 = vrot.slane %v1121_v2, 4 }
 0x516   : > { %v1145_v9 = vperm.slane %v1137_v6, %v1074_v31  ;;  %v1674_v6 = vld [vmem:[%s2190_s10] ss:$0 sm:$0xff] }
 0x517   : > { %v1125_v10 = vsel %vm1044_vm8, %v1110_v5, %v1124_v4  ;;  %v1122_v11 = vrot.slane %v1110_v5, 4  ;;  %v1135_v12 = vsel %vm1044_vm8, %v1134_v7, %v1115_v54  ;;  %v1578_v4 = vld [vmem:[%s2191_s11 + $0x8] sm:$0xff]  ;;  %v1577_v5 = vld [vmem:[%s2191_s11] sm:$0xff] }
 0x518   : > { %v1133_v13 = vperm.slane %v1125_v10, %v1074_v31  ;;  %v1150_v14 = vrot.slane %v1145_v9, 4  ;;  %v1141_v15 = vperm.slane %v1135_v12, %v1074_v31 }
 0x519   : > { %v1123_v16 = vsel %vm1044_vm8, %v1122_v11, %v1104_v62 }
 0x51a   : > { %v1151_v17 = vsel %vm1044_vm8, %v1150_v14, %v1133_v13  ;;  %v1152_v18 = vrot.slane %v1133_v13, 4  ;;  %v1129_v19 = vperm.slane %v1123_v16, %v1074_v31  ;;  %v1146_v21 = vrot.slane %v1141_v15, 4  ;;  %v1675_v13 = vld [vmem:[%s2192_s12] ss:$0 sm:$0xff] }
 0x51b   : > { %1159 = vrot.lane.b32.xlu0 %v1151_v17, %s1821_s30 }
 0x51c   : > { %v1153_v20 = vsel %vm1044_vm8, %v1145_v9, %v1152_v18  ;;  %v1148_v22 = vrot.slane %v1129_v19, 4  ;;  %v1147_v23 = vsel %vm1044_vm8, %v1146_v21, %v1129_v19 }
 0x51d   : > { %1163 = vrot.lane.b32.xlu1 %v1153_v20, %s1822_s0  ;;  %s568_s0 = sand.u32 1, %s1794_s25  }
 0x51e   : > { %v1149_v24 = vsel %vm1044_vm8, %v1141_v15, %v1148_v22  ;;  %s1371_s27 = scalar_lea.sflag [#allocation7], %s568_s0 }
 0x51f   : > { %1155 = vrot.lane.b32.xlu2 %v1149_v24, %s1823_s19  ;;  %s1476_s19 = sshll.u32 %s568_s0, 3 }
 0x520   : > { %s570_s1 = scalar_lea.vmem [#allocation8], %s1476_s19  ;;  %s1748_s19 = scalar_lea.hbm %s2226_s18, 16 }
 0x521   : > { %s1384_s30 = sshll.u32 %s570_s1, 4  ;;  %p1750_p6 = scmp.lt.s32.totalorder %s1748_s19, %s1744_s23  ;;  %s1385_s30 = int_to_ptr.vmem [resolvable:$true] %s1384_s30 }
 0x523   : > { %p1751_p7 = por %p1750_p6, %p1749_p5 }
 0x525   : > { %p1752_p9 = pnand %p1751_p7, %p1747_p3 }
 0x579   : > { %v1156_v27 = vpop.permute.xlu2 %1155 }
 0x57a   : > { %v1166_v28 = vsel %vm829_vm7, %v1147_v23, %v1156_v27 }
 0x58d   : > { %v1160_v29 = vpop.permute.xlu0 %1159 }
 0x58e   : > { %v1168_v30 = vsel %vm1167_vm9, %v1166_v28, %v1160_v29 }
 0x58f   : > { %v1164_v31 = vpop.permute.xlu1 %1163 }
 0x590   : > { %v1170_v32 = vsel %vm1169_vm10, %v1168_v30, %v1164_v31 }
 0x591   : > { %v1171_v33 = vpack.c.bf16 %v1170_v32, %v1170_v32 }
 0x593   : > { %1521 = vmatmul.msk.bf16.vlgmr.msra.gmra.mxu2 %vm583_vm0, %v1171_v33 }
 0x616   : > { %v1204_v35 = vpop.f32.mrf.mxu2 }
 0x617   : > { %v1205_v37 = vadd.f32 %v1671_v34, %v1204_v35 }
 0x619   : > { %v1208_v38 = vadd.f32 %v1205_v37, %v2009_v36  ;;  %v1584_v36 = vld [vmem:[%s2191_s11 + $0x38] sm:$0xff] }
 0x61a   : > { %1355 = vmatpush.bf16.msra.mxu0 %v1584_v36 }
 0x61b   : > { %v1211_v39 = vsel %vm583_vm0, %v1208_v38, 0.0 }
 0x61c   : > { %1212 = vadd.xlane.f32.xlu2 %v1211_v39 }
 0x61e   : > { %v1206_v40 = vpop.f32.mrf.mxu2  ;;  %1356 = vmatpush.bf16.msra.mxu0 %v1583_v50 }
 0x622   : > { %1357 = vmatpush.bf16.msra.mxu0 %v1582_v52 }
 0x626   : > { %1358 = vmatpush.bf16.msra.mxu0 %v1581_v53 }
 0x68f   : > { %v1213_v41 = vpop.xlane.xlu2 %1212 }
 0x690   : > { %v1221_v42 = vmul.f32 %v1213_v41, %v1978_v8 }
 0x692   : > { %v1222_v43 = vsub.f32 %v1208_v38, %v1221_v42 }
 0x694   : > { %v1223_v44 = vmul.f32 %v1222_v43, %v1222_v43 }
 0x696   : > { %v1224_v45 = vsel %vm583_vm0, %v1223_v44, 0.0 }
 0x697   : > { %1225 = vadd.xlane.f32.xlu0 %v1224_v45 }
 0x70a   : > { %v1226_v48 = vpop.xlane.xlu0 %1225 }
 0x70b   : > { %v1227_v49 = vmul.f32 %v1226_v48, %v1978_v8  ;;  %v1580_v8 = vld [vmem:[%s2191_s11 + $0x18] sm:$0xff] }
 0x70c   : > { %1359 = vmatpush.bf16.msra.mxu0 %v1580_v8 }
 0x70d   : > { %v1228_v51 = vadd.f32 1e-12, %v1227_v49 }
 0x70f   : > { %1696 = vrsqrt.f32 %v1228_v51  ;;  %vm1235_vm12 = vweird.f32 %v1228_v51 }
 0x710   : > { %1360 = vmatpush.bf16.msra.mxu0 %v1579_v58 }
 0x714   : > { %1361 = vmatpush.bf16.msra.mxu0 %v1578_v4 }
 0x715   : > { %v1697_v55 = vpop.eup %1696 }
 0x716   : > { %v1230_v56 = vmul.f32 %v1697_v55, %v1228_v51  ;;  %vm1236_vm11 = vweird.f32 %v1697_v55 }
 0x717   : > { %vm1237_vm13 = vmor %vm1235_vm12, %vm1236_vm11 }
 0x718   : > { %v1231_v54 = vmul.f32 %v1697_v55, %v1230_v56  ;;  %1362 = vmatpush.bf16.msra.mxu0 %v1577_v5 }
 0x71a   : > { %v1232_v57 = vmul.f32 0.5, %v1231_v54 }
 0x71c   : > { %v1233_v59 = vsub.f32 1.5, %v1232_v57 }
 0x71e   : > { %v1234_v60 = vmul.f32 %v1697_v55, %v1233_v59 }
 0x720   : > { %v1238_v62 = vsel %vm1237_vm13, %v1697_v55, %v1234_v60 }
 0x721   : > { %v1239_v0 = vmul.f32 %v1238_v62, %v1222_v43 }
 0x723   : > { %v1243_v1 = vmul.f32 %v1672_v61, %v1239_v0 }
 0x725   : > { %v1247_v2 = vadd.f32 %v1673_v63, %v1243_v1 }
 0x727   : > { %v1248_v3 = vpack.c.bf16 %v1247_v2, %v1247_v2 }
 0x729   : > { %1530 = vmatmul.msk.bf16.vlgmr.msrb.gmra.mxu3 %vm583_vm0, %v1248_v3 }
 0x7ac   : > { %v1281_v7 = vpop.f32.mrf.mxu3 }
 0x7ad   : > { %v1282_v9 = vadd.f32 %v1674_v6, %v1281_v7 }
 0x7af   : > { %v1285_v10 = vmax.f32 %v1282_v9, 0.0 }
 0x7b1   : > { %v1286_v11 = vpack.c.bf16 %v1285_v10, %v1285_v10 }
 0x7b3   : > { %1363 = vmatmul.bf16.vlgmr.msra.gmra.mxu0 %v1286_v11 }
 0x7b4   : > { %v1283_v12 = vpop.f32.mrf.mxu3 }
 0x830   : > { %v1364_v14 = vpop.f32.mrf.mxu0 }
 0x831   : > { %v1365_v15 = vadd.f32 %v1675_v13, %v1364_v14 }
 0x833   : > { %v1368_v16 = vadd.f32 %v1365_v15, %v1247_v2 }
 0x835   : > { %1369 = vst.msk [vmem:[%s570_s1] sm:$0xff] %vm583_vm0, %v1368_v16 }
 0x836   : > { %1755 = shalt.err (!%p1752_p9)
}
 0x837   : > { %1589 = dma.vmem_to_hbm [thread:$0]  (%p1954_p4), %s1385_s30, 128, %s1387_s4, %s1371_s27  }
 0x838   : > { %v1366_v17 = vpop.f32.mrf.mxu0 }
 0x839 PF: > { %s2228_s0 = sld [smem:[#allocation11_spill]]  ;;  %p1601_p10 = scmp.ge.s32.totalorder %s1810_s29, 2 }
 0x83b   : > { %p1596_p11 = pnand %p1601_p10, %p1961_p8 }
 0x83d   : > { %p1597_p12 = pneg %p1596_p11 }
 0x83f   : > { %s1398_s28 = sand.u32 1, %s2228_s0  }
 0x840   : > { %s1399_s1 = scalar_lea.sflag [#allocation7], %s1398_s28 }
 0x841   : > { %1785 = dma.done.wait (%p1597_p12), %s1399_s1, 128  }
 0x842   : > { %1787 = vsyncadd (%p1597_p12), %s1399_s1, 4294967168  ;;  %s31_s29 = sadd.s32 1, %s1810_s29   ;;  %s2229_s27 = sld [smem:[#allocation12_spill]] }
 0x843   : > { %p28_p13 = scmp.ge.s32.totalorder %s31_s29, 4   ;;  %s2230_s28 = sld [smem:[#allocation13_spill]] }
 0x844   : > { %s2231_s24 = smov %s1794_s25  ;;  %s2232_s25 = smov %s1798_s26 }
 0x845   : > { %s2233_s26 = smov %s1967_s22  ;;  %30 = sbr.rel (!%p28_p13) target bundleno = 14 (0xe), region = 133 }
 0x84a   :  { %1405 = vsyncpa [#allocation6], 1 }
 0x84b   :  { %1407 = vsyncpa [#allocation6 + $0x1], 1 }
 0x84c   :  { %1408 = vsyncpa [#allocation7], 1 }
 0x84d   :  { %1410 = vsyncpa [#allocation7 + $0x1], 1 }

</bundles_post_ra>
